<compile_context>
chip_gen: v6e
topology: v6e:2x2x1
jax: 0.10.0
libtpu: 0.0.40
codegen_flags: <defaults>
</compile_context>

<pallas_src>
import jax
import jax.numpy as jnp
from jax.experimental import pallas as pl
from jax.experimental.pallas import tpu as pltpu

FACE_MASK_FIX_RATE = 1.7  # module-level scalar constant in the reference


def _make_face_rse_kernel(C):
    """Kernel over 2*C input refs (C coords of y_true, then C of y_pred) + out."""

    def kernel(*refs):
        yt_refs = refs[:C]
        yp_refs = refs[C:2 * C]
        out_ref = refs[2 * C]

        # grid = (num_n_tiles [parallel], num_b_tiles [arbitrary]); the output
        # block index is constant across the inner batch axis, so the
        # (8, tile_n) block stays resident in VMEM while we accumulate over B.
        @pl.when(pl.program_id(1) == 0)
        def _():
            out_ref[...] = jnp.zeros_like(out_ref)

        # Each coordinate is a dense (bt, tile_n) slab -> pure VPU sub/FMA.
        sq = None
        for c in range(C):
            d = yt_refs[c][...].astype(jnp.float32) - yp_refs[c][...].astype(jnp.float32)
            sq = d * d if sq is None else sq + d * d

        dist = jnp.sqrt(sq)  # (bt, tile_n) per-point distances for this batch tile

        # Collapse bt rows -> 8 sublanes with aligned VPU adds (no XLU reduce
        # per step); bt is always a multiple of 8.
        bt = dist.shape[0]
        acc = dist[0:8, :]
        for g in range(1, bt // 8):
            acc = acc + dist[g * 8:(g + 1) * 8, :]
        out_ref[...] += acc

    return kernel


def _largest_divisor_le(n, cap):
    cap = max(1, min(n, cap))
    for d in range(cap, 0, -1):
        if n % d == 0:
            return d
    return 1


def _choose_tiles(B_pad, N_pad, itemsize, max_block_vmem_bytes):
    """Pick (bt, tile_n): tile_n | N_pad (multiple of 128, >=2 N tiles when
    possible for v7x megacore), bt multiple of 8 dividing B_pad, one input
    block under the VMEM budget."""
    units = N_pad // 128
    cap_units = min(units, 32)          # cap tile_n at 4096 lanes before growing bt
    if units >= 2:
        cap_units = min(cap_units, units // 2)   # guarantee >= 2 parallel N tiles
    tile_n = _largest_divisor_le(units, max(1, cap_units)) * 128

    row_bytes = tile_n * itemsize
    max_bt_groups = max(1, max_block_vmem_bytes // (8 * row_bytes))
    bt = 8 * _largest_divisor_le(B_pad // 8, max_bt_groups)
    return bt, tile_n


def face_rse(y_true, y_pred, face_mask, *, max_block_vmem_bytes=2 * 1024 * 1024):
    """Pallas implementation of FaceRSE.forward.

    y_true, y_pred : (B, C, N) float arrays
    face_mask      : (N,) float array
    returns scalar float32 loss
    """
    B, C, N = y_true.shape
    assert y_pred.shape == (B, C, N)
    assert face_mask.shape == (N,)

    # Pad to alignment (zeros contribute exactly 0 to the final sum).
    B_pad = ((B + 7) // 8) * 8
    N_pad = ((N + 127) // 128) * 128
    yt, yp = y_true, y_pred
    if B_pad != B or N_pad != N:
        pad = ((0, B_pad - B), (0, 0), (0, N_pad - N))
        yt = jnp.pad(yt, pad)
        yp = jnp.pad(yp, pad)

    # FREE reshape: (B_pad, C, N_pad) -> (B_pad, C * N_pad).  Coordinate c
    # occupies the contiguous column range [c*N_pad, (c+1)*N_pad).
    yt2 = yt.reshape(B_pad, C * N_pad)
    yp2 = yp.reshape(B_pad, C * N_pad)

    itemsize = jnp.dtype(y_true.dtype).itemsize
    bt, tile_n = _choose_tiles(B_pad, N_pad, itemsize, max_block_vmem_bytes)
    n_blocks = N_pad // tile_n
    grid = (n_blocks, B_pad // bt)

    def coord_spec(c):
        # Dense (bt, tile_n) block of coordinate c, n-tile j, batch-tile b.
        return pl.BlockSpec((bt, tile_n), lambda j, b, c=c: (b, c * n_blocks + j))

    in_specs = [coord_spec(c) for c in range(C)] + [coord_spec(c) for c in range(C)]

    partials = pl.pallas_call(
        _make_face_rse_kernel(C),
        out_shape=jax.ShapeDtypeStruct((8, N_pad), jnp.float32),
        grid_spec=pltpu.PrefetchScalarGridSpec(
            num_scalar_prefetch=0,
            grid=grid,
            in_specs=in_specs,
            # Constant block index across the inner (batch) axis -> resident
            # lane-dense accumulator, written back once per N tile.
            out_specs=pl.BlockSpec((8, tile_n), lambda j, b: (0, j)),
        ),
        compiler_params=pltpu.CompilerParams(
            # N-tile axis parallel (>=2 tiles when possible -> v7x 2-TC
            # sharding); batch axis is the accumulation axis -> arbitrary.
            dimension_semantics=("parallel", "arbitrary"),
            # Explicit limit: above v5e's 16 MiB scoped default, well inside
            # v7x's 64 MiB physical VMEM (6 streams x 2 bufs x <=2 MiB blocks).
            vmem_limit_bytes=40 * 1024 * 1024,
        ),
    )(*([yt2] * C + [yp2] * C))

    # Tiny final reduction: collapse 8 sublanes, apply mask with the fix-rate
    # and the mean's 1/(B*N) folded in (mask is batch-independent, so applying
    # it after the batch sum is exact).
    per_point = jnp.sum(partials, axis=0)[:N]
    mask_scaled = face_mask.astype(jnp.float32) * jnp.float32(FACE_MASK_FIX_RATE / (B * N))
    return jnp.sum(per_point * mask_scaled)


def face_rse_ref(y_true, y_pred, face_mask):
    dist = jnp.sqrt(jnp.sum((y_true - y_pred) ** 2, axis=1))
    dist = dist * (face_mask[None, :] * FACE_MASK_FIX_RATE)
    return jnp.mean(dist)


if __name__ == "__main__":
    key = jax.random.PRNGKey(0)
    k1, k2, k3 = jax.random.split(key, 3)

    # Aligned case: B=4, C=3 (xyz), N=1024 face points.
    B, C, N = 4, 3, 1024
    y_true = jax.random.normal(k1, (B, C, N), dtype=jnp.float32)
    y_pred = jax.random.normal(k2, (B, C, N), dtype=jnp.float32)
    face_mask = (jax.random.uniform(k3, (N,)) > 0.3).astype(jnp.float32)

    loss = jax.block_until_ready(face_rse(y_true, y_pred, face_mask))
    ref = face_rse_ref(y_true, y_pred, face_mask)
    assert jnp.allclose(loss, ref, rtol=1e-5, atol=1e-5), (loss, ref)

    # Unaligned case (exercises B/N zero-padding path): B=3, N=200.
    B2, N2 = 3, 200
    yt2 = jax.random.normal(k1, (B2, C, N2), dtype=jnp.float32)
    yp2 = jax.random.normal(k2, (B2, C, N2), dtype=jnp.float32)
    fm2 = (jax.random.uniform(k3, (N2,)) > 0.3).astype(jnp.float32)

    loss2 = jax.block_until_ready(face_rse(yt2, yp2, fm2))
    ref2 = face_rse_ref(yt2, yp2, fm2)
    assert jnp.allclose(loss2, ref2, rtol=1e-5, atol=1e-5), (loss2, ref2)

    print("KERNEL_OK")
</pallas_src>

<mosaic_0001>
module attributes {stable_mosaic.version = 11 : i64} {
  func.func @kernel(%arg0: i32, %arg1: i32, %arg2: memref<8x512xf32, #tpu.memory_space<vmem>>, %arg3: memref<8x512xf32, #tpu.memory_space<vmem>>, %arg4: memref<8x512xf32, #tpu.memory_space<vmem>>, %arg5: memref<8x512xf32, #tpu.memory_space<vmem>>, %arg6: memref<8x512xf32, #tpu.memory_space<vmem>>, %arg7: memref<8x512xf32, #tpu.memory_space<vmem>>, %arg8: memref<8x512xf32, #tpu.memory_space<vmem>>) attributes {dimension_semantics = [#tpu.dimension_semantics<parallel>, #tpu.dimension_semantics<arbitrary>], iteration_bounds = array<i64: 2, 1>, scalar_prefetch = 0 : i64, scratch_operands = 0 : i64, tpu.core_type = #tpu.core_type<tc>, window_params = [{transform_indices = @transform_0, window_bounds = array<i64: 8, 512>}, {transform_indices = @transform_1, window_bounds = array<i64: 8, 512>}, {transform_indices = @transform_2, window_bounds = array<i64: 8, 512>}, {transform_indices = @transform_3, window_bounds = array<i64: 8, 512>}, {transform_indices = @transform_4, window_bounds = array<i64: 8, 512>}, {transform_indices = @transform_5, window_bounds = array<i64: 8, 512>}, {transform_indices = @transform_6, window_bounds = array<i64: 8, 512>}]} {
    %c0_i32 = arith.constant 0 : i32
    %0 = arith.cmpi eq, %arg1, %c0_i32 : i32
    %1 = arith.extui %0 : i1 to i32
    %c0_i32_0 = arith.constant 0 : i32
    %2 = arith.cmpi ne, %1, %c0_i32_0 : i32
    scf.if %2 {
      %cst = arith.constant 0.000000e+00 : f32
      %21 = vector.broadcast %cst : f32 to vector<8x512xf32>
      %c0_16 = arith.constant 0 : index
      %c0_17 = arith.constant 0 : index
      %22 = vector.load %arg8[%c0_16, %c0_17] : memref<8x512xf32, #tpu.memory_space<vmem>>, vector<8x512xf32>
      tpu.vector_store %arg8[%c0_16, %c0_17], %21 {strides = array<i32>} : memref<8x512xf32, #tpu.memory_space<vmem>>, vector<8x512xf32>,
    } else {
    }
    %c0 = arith.constant 0 : index
    %c0_1 = arith.constant 0 : index
    %3 = vector.load %arg2[%c0, %c0_1] : memref<8x512xf32, #tpu.memory_space<vmem>>, vector<8x512xf32>
    %c0_2 = arith.constant 0 : index
    %c0_3 = arith.constant 0 : index
    %4 = vector.load %arg5[%c0_2, %c0_3] : memref<8x512xf32, #tpu.memory_space<vmem>>, vector<8x512xf32>
    %5 = arith.subf %3, %4 : vector<8x512xf32>
    %6 = arith.mulf %5, %5 : vector<8x512xf32>
    %c0_4 = arith.constant 0 : index
    %c0_5 = arith.constant 0 : index
    %7 = vector.load %arg3[%c0_4, %c0_5] : memref<8x512xf32, #tpu.memory_space<vmem>>, vector<8x512xf32>
    %c0_6 = arith.constant 0 : index
    %c0_7 = arith.constant 0 : index
    %8 = vector.load %arg6[%c0_6, %c0_7] : memref<8x512xf32, #tpu.memory_space<vmem>>, vector<8x512xf32>
    %9 = arith.subf %7, %8 : vector<8x512xf32>
    %10 = arith.mulf %9, %9 : vector<8x512xf32>
    %11 = arith.addf %6, %10 : vector<8x512xf32>
    %c0_8 = arith.constant 0 : index
    %c0_9 = arith.constant 0 : index
    %12 = vector.load %arg4[%c0_8, %c0_9] : memref<8x512xf32, #tpu.memory_space<vmem>>, vector<8x512xf32>
    %c0_10 = arith.constant 0 : index
    %c0_11 = arith.constant 0 : index
    %13 = vector.load %arg7[%c0_10, %c0_11] : memref<8x512xf32, #tpu.memory_space<vmem>>, vector<8x512xf32>
    %14 = arith.subf %12, %13 : vector<8x512xf32>
    %15 = arith.mulf %14, %14 : vector<8x512xf32>
    %16 = arith.addf %11, %15 : vector<8x512xf32>
    %17 = math.sqrt %16 : vector<8x512xf32>
    %c0_12 = arith.constant 0 : index
    %c0_13 = arith.constant 0 : index
    %18 = vector.load %arg8[%c0_12, %c0_13] : memref<8x512xf32, #tpu.memory_space<vmem>>, vector<8x512xf32>
    %19 = arith.addf %18, %17 : vector<8x512xf32>
    %c0_14 = arith.constant 0 : index
    %c0_15 = arith.constant 0 : index
    %20 = vector.load %arg8[%c0_14, %c0_15] : memref<8x512xf32, #tpu.memory_space<vmem>>, vector<8x512xf32>
    tpu.vector_store %arg8[%c0_14, %c0_15], %19 {strides = array<i32>} : memref<8x512xf32, #tpu.memory_space<vmem>>, vector<8x512xf32>,
    return
  }
  func.func @transform_0(%arg0: i32, %arg1: i32) -> (i32, i32) {
    %c0_i32 = arith.constant 0 : i32
    %0 = arith.addi %c0_i32, %arg0 : i32
    %c0_i32_0 = arith.constant 0 : i32
    return %arg1, %0 : i32, i32
  }
  func.func @transform_1(%arg0: i32, %arg1: i32) -> (i32, i32) {
    %c2_i32 = arith.constant 2 : i32
    %0 = arith.addi %c2_i32, %arg0 : i32
    %c0_i32 = arith.constant 0 : i32
    return %arg1, %0 : i32, i32
  }
  func.func @transform_2(%arg0: i32, %arg1: i32) -> (i32, i32) {
    %c4_i32 = arith.constant 4 : i32
    %0 = arith.addi %c4_i32, %arg0 : i32
    %c0_i32 = arith.constant 0 : i32
    return %arg1, %0 : i32, i32
  }
  func.func @transform_3(%arg0: i32, %arg1: i32) -> (i32, i32) {
    %c0_i32 = arith.constant 0 : i32
    %0 = arith.addi %c0_i32, %arg0 : i32
    %c0_i32_0 = arith.constant 0 : i32
    return %arg1, %0 : i32, i32
  }
  func.func @transform_4(%arg0: i32, %arg1: i32) -> (i32, i32) {
    %c2_i32 = arith.constant 2 : i32
    %0 = arith.addi %c2_i32, %arg0 : i32
    %c0_i32 = arith.constant 0 : i32
    return %arg1, %0 : i32, i32
  }
  func.func @transform_5(%arg0: i32, %arg1: i32) -> (i32, i32) {
    %c4_i32 = arith.constant 4 : i32
    %0 = arith.addi %c4_i32, %arg0 : i32
    %c0_i32 = arith.constant 0 : i32
    return %arg1, %0 : i32, i32
  }
  func.func @transform_6(%arg0: i32, %arg1: i32) -> (i32, i32) {
    %c0_i32 = arith.constant 0 : i32
    %c0_i32_0 = arith.constant 0 : i32
    return %c0_i32, %arg0 : i32, i32
  }
}

</mosaic_0001>

<bundles_post_ra>
// kernel: tpu_custom_call.1
= control target key start
LH: loop header
LB: loop body
LE: loop exit
PB: predicated region body
PF: predicated region fallthrough
CT: control target
= control target key end

     0   :  { %s1779_s0 = inlined_call_operand.hbm [shape: f32[8,3072], index: 0, kind: input, shape index: {}]   ;;  %s1780_s1 = inlined_call_operand.hbm [shape: f32[8,3072], index: 1, kind: input, shape index: {}]   ;;  %s1781_s2 = inlined_call_operand.hbm [shape: f32[8,3072], index: 2, kind: input, shape index: {}]   ;;  %s1782_s3 = inlined_call_operand.hbm [shape: f32[8,3072], index: 3, kind: input, shape index: {}]   ;;  %s1783_s4 = inlined_call_operand.hbm [shape: f32[8,3072], index: 4, kind: input, shape index: {}]   ;;  %s1784_s5 = inlined_call_operand.hbm [shape: f32[8,3072], index: 5, kind: input, shape index: {}]   ;;  %s1785_s6 = inlined_call_operand.hbm [shape: f32[8,1024], index: 6, kind: output, shape index: {}]  }
   0x1   :  { %1808 = sst [smem:[#allocation34_spill]] %s1780_s1 }
   0x2   :  { %1809 = sst [smem:[#allocation35_spill]] %s1782_s3 }
   0x3   :  { %1810 = sst [smem:[#allocation36_spill]] %s1785_s6 }
   0x4   :  { %11 = vsyncpa [#allocation3], 0 }
   0x5   :  { %13 = vsyncpa [#allocation3 + $0x1], 0 }
   0x6   :  { %14 = vsyncpa [#allocation6], 0 }
   0x7   :  { %16 = vsyncpa [#allocation6 + $0x1], 0 }
   0x8   :  { %17 = vsyncpa [#allocation9], 0 }
   0x9   :  { %19 = vsyncpa [#allocation9 + $0x1], 0 }
   0xa   :  { %20 = vsyncpa [#allocation12], 0 }
   0xb   :  { %22 = vsyncpa [#allocation12 + $0x1], 0 }
   0xc   :  { %23 = vsyncpa [#allocation4], 0 }
   0xd   :  { %25 = vsyncpa [#allocation4 + $0x1], 0  ;;  %s1389_s21 = smov 0   ;;  %s1391_s22 = smov 0  }
   0xe   :  { %s1393_s23 = smov 0   ;;  %s1395_s24 = smov 0  }
   0xf   :  { %s1397_s25 = smov 0   ;;  %s1399_s26 = smov 0  }
  0x10   :  { %s1401_s27 = smov 0   ;;  %s1403_s28 = smov 0  }
  0x11   :  { %s1405_s29 = smov 0   ;;  %s1407_s30 = smov 0  }
  0x12   :  { %s1409_s7 = smov 0   ;;  %s1411_s8 = smov 0  }
  0x13 LB: > { %1811 = sst [smem:[#allocation21_spill]] %s1317_s25  ;;  %s1448_s9 = sadd.s32 4294967295, %s1345_s8   ;;  %s1345_s8 = sphi %s1411_s8, %s31_s8   ;;  %s1341_s7 = sphi %s1409_s7, %s1866_s7   ;;  %s1337_s30 = sphi %s1407_s30, %s1865_s30   ;;  %s1333_s29 = sphi %s1405_s29, %s1861_s29   ;;  %s1329_s28 = sphi %s1403_s28, %s1860_s28   ;;  %s1325_s27 = sphi %s1401_s27, %s1859_s27   ;;  %s1321_s26 = sphi %s1399_s26, %s1858_s26   ;;  %s1317_s25 = sphi %s1397_s25, %s1857_s25   ;;  %s1313_s24 = sphi %s1395_s24, %s1856_s24   ;;  %s1309_s23 = sphi %s1393_s23, %s1864_s23   ;;  %s1305_s22 = sphi %s1391_s22, %s1863_s22   ;;  %s1301_s21 = sphi %s1389_s21, %s1862_s21  }
  0x14   : > { %1812 = sst [smem:[#allocation22_spill]] %s1321_s26  ;;  %s43_s10 = sadd.s32 1, %s1341_s7 }
  0x15   : > { %1813 = sst [smem:[#allocation23_spill]] %s1325_s27  ;;  %p45_p0 = scmp.ge.s32.totalorder %s43_s10, 2 }
  0x16   : > { %1814 = sst [smem:[#allocation24_spill]] %s1329_s28  ;;  %p1804_p1 = scmp.eq.s32.totalorder %s1345_s8, 0 }
  0x17   : > { %1815 = sst [smem:[#allocation25_spill]] %s1333_s29  ;;  %p1803_p2 = scmp.eq.s32.totalorder %s1448_s9, 0 }
  0x18   : > { %1816 = sst [smem:[#allocation26_spill]] %s1337_s30  ;;  %s75_s11 = sadd.s32 2, %s1341_s7 }
  0x19   : > { %s1868_s10 = smov (%p45_p0, %s43_s10), 0  ;;  %s82_s12 = sadd.s32 1, %s1321_s26 }
  0x1a   : > { %p89_p3 = scmp.ne.s32.totalorder %s1321_s26, %s1317_s25  ;;  %s76_s13 = sadd.s32 2, %s1868_s10 }
  0x1b   : > { %p95_p4 = scmp.ne.s32.totalorder %s1317_s25, %s1313_s24  ;;  %s78_s14 = ssub.s32 %s75_s11, %s76_s13 }
  0x1c   : > { %p1463_p5 = por %p89_p3, %p1804_p1  ;;  %p80_p6 = scmp.eq.s32.totalorder %s78_s14, 0 }
  0x1d   : > { %p1469_p7 = por %p95_p4, %p1803_p2  ;;  %p1802_p9 = scmp.lt.s32.totalorder %s1345_s8, 2 }
  0x1e   : > { %s1476_s17 = scalar_select %p80_p6, %s1321_s26, %s82_s12  }
  0x1f   : > { %s1818_s16 = scalar_select %p1469_p7, 1, 0 }
  0x20   : > { %1820 = sst [smem:[#allocation28_spill]] %s1476_s17  ;;  %s1479_s18 = sshll.u32 %s1341_s7, 9 }
  0x21   : > { %1819 = sst [smem:[#allocation27_spill]] %s1818_s16  ;;  %s1789_s19 = sand.u32 1, %s1345_s8  }
  0x22   : > { %s286_s20 = sand.u32 1, %s1321_s26   ;;  %s1821_s1 = sld [smem:[#allocation34_spill]] }
  0x23   : > { %s1483_s24 = sshll.u32 %s286_s20, 5  ;;  %p1494_p10 = pnand %p1802_p9, %p1463_p5 }
  0x24   : > { %s288_s30 = scalar_lea.vmem [#allocation5], %s1483_s24  ;;  %p861_p11 = scmp.ge.s32.totalorder %s1345_s8, 1 }
  0x25   : > { %s299_s25 = sshll.u32 %s288_s30, 4  ;;  %s1501_s20 = scalar_lea.sflag [#allocation6], %s1789_s19  ;;  %s300_s25 = int_to_ptr.vmem [resolvable:$true] %s299_s25 }
  0x26   : > { %p1788_p12 = pneg %p1494_p10  ;;  %s1038_s11 = scalar_lea.vmem %s300_s25, 512 }
  0x27   : > { %p1039_p13 = scmp.ne.s32.totalorder %s300_s25, %s1038_s11  ;;  %s1347_s30 = smov [#allocation5]  }
  0x28   : > { %s678_s14 = scalar_lea.hbm %s1821_s1, %s1479_s18  ;;  %s1043_s15 = sshll.u32 %s1347_s30, 4  ;;  %s1044_s15 = int_to_ptr.vmem [resolvable:$false] %s1043_s15 }
  0x29   : > { %s679_s6 = scalar_lea.hbm %s678_s14, 1024  ;;  %p1041_p0 = pnand %p1039_p13, %p1788_p12 }
  0x2a   : > { %s1045_s13 = scalar_lea.vmem %s1044_s15, 1024  ;;  %p1046_p4 = scmp.lt.s32.totalorder %s300_s25, %s1044_s15 }
  0x2b   : > { %p1042_p3 = pneg %p1041_p0  ;;  %p1047_p5 = scmp.lt.s32.totalorder %s1045_s13, %s1038_s11 }
  0x2d   : > { %p1048_p6 = por %p1047_p5, %p1046_p4 }
  0x2f   : > { %p1049_p8 = pnand %p1048_p6, %p1042_p3 }
  0x31   : > { %1052 = shalt.err (!%p1049_p8)
}
  0x32   : > { %901 = dma.hbm_to_vmem [thread:$0]  (!%p1494_p10), %s679_s6, 512, %s300_s25, %s1501_s20  }
  0x33   : > { %p391_p8 = scmp.lt.s32.totalorder %s1345_s8, 3  ;;  %s840_s11 = sadd.s32 4294967294, %s1345_s8  }
  0x34   : > { %s48_s30 = ssub.s32 %s1341_s7, %s1868_s10  ;;  %s52_s15 = sadd.s32 1, %s1333_s29 }
  0x35   : > { %p1514_p13 = pnand %p861_p11, %p391_p8  ;;  %p50_p0 = scmp.eq.s32.totalorder %s48_s30, 0 }
  0x36   : > { %p59_p3 = scmp.ne.s32.totalorder %s1333_s29, %s1329_s28  ;;  %p65_p4 = scmp.ne.s32.totalorder %s1329_s28, %s1325_s27 }
  0x37   : > { %s1823_s14 = scalar_select %p1514_p13, 1, 0 }
  0x38   : > { %s1527_s13 = scalar_select %p50_p0, %s1333_s29, %s52_s15  }
  0x39   : > { %1824 = sst [smem:[#allocation29_spill]] %s1823_s14  ;;  %p61_p5 = por %p1804_p1, %p59_p3 }
  0x3a   : > { %1825 = sst [smem:[#allocation30_spill]] %s1527_s13  ;;  %p1533_p6 = por %p1803_p2, %p65_p4 }
  0x3b   : > { %p237_p11 = scmp.eq.s32.totalorder %s1448_s9, 1  ;;  %p243_p8 = scmp.eq.s32.totalorder %s840_s11, 1 }
  0x3c   : > { %s1826_s6 = scalar_select %p1533_p6, 1, 0 }
  0x3d   : > { %s263_s25 = sand.u32 1, %s1333_s29   ;;  %p1541_p12 = pnand %p1802_p9, %p61_p5 }
  0x3e   : > { %1827 = sst [smem:[#allocation31_spill]] %s1826_s6  ;;  %p1545_p7 = por %p237_p11, %p59_p3 }
  0x3f   : > { %p1549_p0 = por %p243_p8, %p65_p4  ;;  %s843_s1 = sshll.u32 %s263_s25, 5 }
  0x40   : > { %s1829_s30 = scalar_select %p1545_p7, 1, 0 }
  0x41   : > { %s1831_s15 = scalar_select %p1549_p0, 1, 0 }
  0x42   : > { %1830 = sst [smem:[#allocation32_spill]] %s1829_s30  ;;  %s332_s29 = scalar_lea.vmem [#allocation8], %s843_s1 }
  0x43   : > { %1832 = sst [smem:[#allocation33_spill]] %s1831_s15  ;;  %s342_s26 = sshll.u32 %s332_s29, 4  ;;  %s343_s26 = int_to_ptr.vmem [resolvable:$true] %s342_s26 }
  0x44   : > { %s1833_s3 = sld [smem:[#allocation35_spill]]  ;;  %s1834_s27 = sand.u32 1, %s1345_s8  }
  0x45   : > { %s1559_s16 = scalar_lea.sflag [#allocation9], %s1834_s27  ;;  %p1056_p3 = pneg %p1541_p12 }
  0x46   : > { %s1067_s6 = scalar_lea.vmem %s343_s26, 512  ;;  %s1348_s15 = smov [#allocation8]  }
  0x47   : > { %p1068_p5 = scmp.ne.s32.totalorder %s343_s26, %s1067_s6  ;;  %s1072_s30 = sshll.u32 %s1348_s15, 4  ;;  %s1073_s30 = int_to_ptr.vmem [resolvable:$false] %s1072_s30 }
  0x48   : > { %s1074_s28 = scalar_lea.vmem %s1073_s30, 1024  ;;  %p1075_p8 = scmp.lt.s32.totalorder %s343_s26, %s1073_s30 }
  0x49   : > { %p1070_p4 = pnand %p1068_p5, %p1056_p3  ;;  %p1076_p9 = scmp.lt.s32.totalorder %s1074_s28, %s1067_s6 }
  0x4a   : > { %s340_s11 = scalar_lea.hbm %s1833_s3, %s1479_s18 }
  0x4b   : > { %p1071_p11 = pneg %p1070_p4  ;;  %p1077_p2 = por %p1076_p9, %p1075_p8 }
  0x4d   : > { %p1078_p1 = pnand %p1077_p2, %p1071_p11 }
  0x4f   : > { %1081 = shalt.err (!%p1078_p1)
}
  0x50   : > { %907 = dma.hbm_to_vmem [thread:$0]  (!%p1541_p12), %s340_s11, 512, %s343_s26, %s1559_s16  }
  0x51   : > { %s275_s17 = scalar_lea.hbm %s1779_s0, %s1479_s18  ;;  %s267_s13 = scalar_lea.vmem [#allocation2], %s843_s1 }
  0x52   : > { %s277_s3 = sshll.u32 %s267_s13, 4  ;;  %s264_s15 = scalar_lea.sflag [#allocation3], %s263_s25  ;;  %s278_s3 = int_to_ptr.vmem [resolvable:$true] %s277_s3 }
  0x53   : > { %s1095_s14 = scalar_lea.vmem %s278_s3, 512  ;;  %s1349_s28 = smov [#allocation2]  }
  0x54   : > { %p1096_p5 = scmp.ne.s32.totalorder %s278_s3, %s1095_s14  ;;  %s1100_s6 = sshll.u32 %s1349_s28, 4  ;;  %s1101_s6 = int_to_ptr.vmem [resolvable:$false] %s1100_s6 }
  0x55   : > { %s1102_s30 = scalar_lea.vmem %s1101_s6, 1024  ;;  %p1103_p9 = scmp.lt.s32.totalorder %s278_s3, %s1101_s6 }
  0x56   : > { %p1098_p2 = pnand %p1096_p5, %p1056_p3  ;;  %p1104_p4 = scmp.lt.s32.totalorder %s1102_s30, %s1095_s14 }
  0x58   : > { %p1099_p1 = pneg %p1098_p2  ;;  %p1105_p11 = por %p1104_p4, %p1103_p9 }
  0x5a   : > { %p1106_p8 = pnand %p1105_p11, %p1099_p1 }
  0x5c   : > { %1109 = shalt.err (!%p1106_p8)
}
  0x5d   : > { %898 = dma.hbm_to_vmem [thread:$0]  (!%p1541_p12), %s275_s17, 512, %s278_s3, %s264_s15  }
  0x5e   : > { %s105_s1 = sadd.s32 4, %s1341_s7  ;;  %s106_s26 = sadd.s32 4, %s1868_s10 }
  0x5f   : > { %s108_s14 = ssub.s32 %s105_s1, %s106_s26  ;;  %s112_s19 = sadd.s32 1, %s1309_s23 }
  0x60   : > { %p110_p3 = scmp.eq.s32.totalorder %s108_s14, 0  ;;  %p119_p5 = scmp.ne.s32.totalorder %s1309_s23, %s1305_s22 }
  0x61   : > { %p125_p2 = scmp.ne.s32.totalorder %s1305_s22, %s1301_s21  ;;  %s308_s25 = sand.u32 1, %s1309_s23  }
  0x62   : > { %s1587_s11 = scalar_select %p110_p3, %s1309_s23, %s112_s19  }
  0x63   : > { %p1835_p1 = scmp.eq.s32.totalorder %s1345_s8, 0  ;;  %p1836_p4 = scmp.eq.s32.totalorder %s1448_s9, 0 }
  0x64   : > { %s1599_s3 = sshll.u32 %s308_s25, 5  ;;  %s687_s13 = scalar_lea.hbm %s1781_s2, %s1479_s18 }
  0x65   : > { %p121_p9 = por %p119_p5, %p1835_p1  ;;  %p1593_p11 = por %p125_p2, %p1836_p4 }
  0x66   : > { %s688_s15 = scalar_lea.hbm %s687_s13, 2048  ;;  %s310_s21 = scalar_lea.vmem [#allocation7], %s1599_s3 }
  0x67   : > { %s321_s28 = sshll.u32 %s310_s21, 4  ;;  %p1838_p12 = scmp.lt.s32.totalorder %s1345_s8, 2  ;;  %s322_s28 = int_to_ptr.vmem [resolvable:$true] %s321_s28 }
  0x68   : > { %s704_s26 = scalar_lea.hbm %s1783_s4, %s1479_s18  ;;  %s1123_s19 = scalar_lea.vmem %s322_s28, 512 }
  0x69   : > { %p1608_p8 = pnand %p1838_p12, %p121_p9  ;;  %s1616_s14 = scalar_lea.hbm %s704_s26, 1024 }
  0x6a   : > { %p1124_p5 = scmp.ne.s32.totalorder %s322_s28, %s1123_s19  ;;  %s1350_s29 = smov [#allocation7]  }
  0x6b   : > { %p1806_p3 = pneg %p1608_p8  ;;  %s1128_s17 = sshll.u32 %s1350_s29, 4  ;;  %s1129_s17 = int_to_ptr.vmem [resolvable:$false] %s1128_s17 }
  0x6c   : > { %s1130_s13 = scalar_lea.vmem %s1129_s17, 1024  ;;  %p1131_p9 = scmp.lt.s32.totalorder %s322_s28, %s1129_s17 }
  0x6d   : > { %p1126_p2 = pnand %p1124_p5, %p1806_p3  ;;  %p1132_p4 = scmp.lt.s32.totalorder %s1130_s13, %s1123_s19 }
  0x6f   : > { %p1127_p1 = pneg %p1126_p2  ;;  %p1133_p12 = por %p1132_p4, %p1131_p9 }
  0x71   : > { %p1134_p0 = pnand %p1133_p12, %p1127_p1 }
  0x73   : > { %1137 = shalt.err (!%p1134_p0)
}
  0x74   : > { %904 = dma.hbm_to_vmem [thread:$0]  (!%p1608_p8), %s688_s15, 512, %s322_s28, %s1501_s20  }
  0x75   : > { %s353_s21 = scalar_lea.vmem [#allocation10], %s1483_s24  ;;  %p1840_p2 = pneg %p1494_p10 }
  0x76   : > { %s364_s30 = sshll.u32 %s353_s21, 4  ;;  %s1351_s26 = smov [#allocation10]   ;;  %s365_s30 = int_to_ptr.vmem [resolvable:$true] %s364_s30 }
  0x77   : > { %s1152_s1 = scalar_lea.vmem %s365_s30, 512  ;;  %s1157_s19 = sshll.u32 %s1351_s26, 4  ;;  %s1158_s19 = int_to_ptr.vmem [resolvable:$false] %s1157_s19 }
  0x78   : > { %p1153_p5 = scmp.ne.s32.totalorder %s365_s30, %s1152_s1  ;;  %s1159_s29 = scalar_lea.vmem %s1158_s19, 1024 }
  0x79   : > { %p1160_p0 = scmp.lt.s32.totalorder %s365_s30, %s1158_s19  ;;  %p1161_p1 = scmp.lt.s32.totalorder %s1159_s29, %s1152_s1 }
  0x7a   : > { %p1155_p3 = pnand %p1153_p5, %p1840_p2 }
  0x7b   : > { %p1162_p9 = por %p1161_p1, %p1160_p0 }
  0x7c   : > { %p1156_p7 = pneg %p1155_p3 }
  0x7e   : > { %p1163_p4 = pnand %p1162_p9, %p1156_p7 }
  0x80   : > { %1166 = shalt.err (!%p1163_p4)
}
  0x81   : > { %910 = dma.hbm_to_vmem [thread:$0]  (!%p1494_p10), %s1616_s14, 512, %s365_s30, %s1559_s16  }
  0x82   : > { %s713_s15 = scalar_lea.hbm %s1784_s5, %s1479_s18  ;;  %s375_s28 = scalar_lea.vmem [#allocation11], %s1599_s3 }
  0x83   : > { %s386_s17 = sshll.u32 %s375_s28, 4  ;;  %s714_s13 = scalar_lea.hbm %s713_s15, 2048  ;;  %s387_s17 = int_to_ptr.vmem [resolvable:$true] %s386_s17 }
  0x84   : > { %s372_s21 = scalar_lea.sflag [#allocation12], %s308_s25  ;;  %s1181_s1 = scalar_lea.vmem %s387_s17, 512 }
  0x85   : > { %p1182_p7 = scmp.ne.s32.totalorder %s387_s17, %s1181_s1  ;;  %p1841_p3 = pneg %p1608_p8 }
  0x86   : > { %s1352_s12 = smov [#allocation11]  }
  0x87   : > { %p1184_p12 = pnand %p1182_p7, %p1841_p3  ;;  %s1186_s26 = sshll.u32 %s1352_s12, 4  ;;  %s1187_s26 = int_to_ptr.vmem [resolvable:$false] %s1186_s26 }
  0x88   : > { %s1188_s16 = scalar_lea.vmem %s1187_s26, 1024  ;;  %p1189_p10 = scmp.lt.s32.totalorder %s387_s17, %s1187_s26 }
  0x89   : > { %p1185_p5 = pneg %p1184_p12  ;;  %p1190_p2 = scmp.lt.s32.totalorder %s1188_s16, %s1181_s1 }
  0x8b   : > { %p1191_p0 = por %p1190_p2, %p1189_p10 }
  0x8d   : > { %p1192_p1 = pnand %p1191_p0, %p1185_p5 }
  0x8f   : > { %1195 = shalt.err (!%p1192_p1)
}
  0x90   : > { %913 = dma.hbm_to_vmem [thread:$0]  (!%p1608_p8), %s714_s13, 512, %s387_s17, %s372_s21  }
  0x91   : > { %395 = sbr.rel (%p1514_p13) target bundleno = 224 (0xe0), region = 44  ;;  %s1843_s25 = sld [smem:[#allocation24_spill]] (!%p1514_p13) }
  0x97   : > { %s1649_s14 = sand.u32 1, %s1843_s25  }
  0x98   : > { %s1652_s30 = sshll.u32 %s1649_s14, 5  ;;  %s398_s19 = scalar_lea.sflag [#allocation3], %s1649_s14 }
  0x99   : > { %s1656_s29 = scalar_lea.vmem [#allocation2], %s1652_s30 }
  0x9a   : > { %1272 = dma.done.wait (%p1533_p6), %s398_s19, 512  }
  0x9b   : > { %1274 = vsyncadd (%p1533_p6), %s398_s19, 4294966784  ;;  %s1845_s6 = sld [smem:[#allocation21_spill]]  ;;  %s406_s20 = sand.u32 1, %s1448_s9  }
  0x9c   : > { %s1846_s24 = sld [smem:[#allocation27_spill]]  ;;  %s407_s17 = scalar_lea.sflag [#allocation6], %s406_s20 }
  0xa1   : > { %s408_s15 = sand.u32 1, %s1845_s6  }
  0xa2   : > { %s863_s28 = sshll.u32 %s408_s15, 5  ;;  %p1847_p13 = scmp.ne.s32.totalorder %s1846_s24, 0 }
  0xa3   : > { %s1664_s13 = scalar_lea.vmem [#allocation5], %s863_s28 }
  0xa4   : > { %1276 = dma.done.wait (%p1847_p13), %s407_s17, 512  }
  0xa5   : > { %1278 = vsyncadd (%p1847_p13), %s407_s17, 4294966784  ;;  %s417_s21 = sand.u32 1, %s1305_s22  }
  0xa6   : > { %s864_s1 = sshll.u32 %s417_s21, 5 }
  0xa7   : > { %s1671_s12 = scalar_lea.vmem [#allocation7], %s864_s1 }
  0xa8   : > { %1280 = dma.done.wait (%p1593_p11), %s407_s17, 512  }
  0xa9   : > { %1282 = vsyncadd (%p1593_p11), %s407_s17, 4294966784  ;;  %s425_s9 = scalar_lea.sflag [#allocation9], %s406_s20  ;;  %s1678_s26 = scalar_lea.vmem [#allocation8], %s1652_s30 }
  0xaa   : > { %1284 = dma.done.wait (%p1533_p6), %s425_s9, 512  }
  0xab   : > { %1286 = vsyncadd (%p1533_p6), %s425_s9, 4294966784  ;;  %s1684_s16 = scalar_lea.vmem [#allocation10], %s863_s28 }
  0xac   : > { %1288 = dma.done.wait (%p1847_p13), %s425_s9, 512  }
  0xad   : > { %1290 = vsyncadd (%p1847_p13), %s425_s9, 4294966784  ;;  %s443_s18 = scalar_lea.sflag [#allocation12], %s417_s21  ;;  %s1690_s25 = scalar_lea.vmem [#allocation11], %s864_s1 }
  0xae   : > { %1292 = dma.done.wait (%p1593_p11), %s443_s18, 512  }
  0xaf   : > { %1294 = vsyncadd (%p1593_p11), %s443_s18, 4294966784  ;;  %v519_v0 = vld [vmem:[%s1656_s29] sm:$0xff]  ;;  %v520_v9 = vld [vmem:[%s1656_s29 + $0x8] sm:$0xff]  ;;  %s1848_s27 = sld [smem:[#allocation26_spill]]  ;;  %s499_s3 = scalar_lea.vmem [#allocation13], %s1652_s30 }
  0xb0   : > { %v523_v1 = vld [vmem:[%s1678_s26] sm:$0xff]  ;;  %v524_v10 = vld [vmem:[%s1678_s26 + $0x8] sm:$0xff]  ;;  %v521_v21 = vld [vmem:[%s1656_s29 + $0x10] sm:$0xff]  ;;  %s1849_s19 = sld [smem:[#allocation32_spill]]  ;;  %s630_s6 = sshll.u32 %s499_s3, 4  ;;  %s631_s6 = int_to_ptr.vmem [resolvable:$true] %s630_s6 }
  0xb1   : > { %v535_v2 = vld [vmem:[%s1664_s13] sm:$0xff]  ;;  %v527_v3 = vsub.f32 %v519_v0, %v523_v1  ;;  %v536_v11 = vld [vmem:[%s1664_s13 + $0x8] sm:$0xff]  ;;  %v528_v13 = vsub.f32 %v520_v9, %v524_v10  ;;  %v525_v22 = vld [vmem:[%s1678_s26 + $0x10] sm:$0xff]  ;;  %s1850_s20 = sld [smem:[#allocation36_spill]]  ;;  %s616_s28 = scalar_lea.sflag [#allocation4], %s1649_s14 }
  0xb2   : > { %v539_v4 = vld [vmem:[%s1684_s16] sm:$0xff]  ;;  %v540_v14 = vld [vmem:[%s1684_s16 + $0x8] sm:$0xff]  ;;  %v537_v23 = vld [vmem:[%s1664_s13 + $0x10] sm:$0xff]  ;;  %v529_v25 = vsub.f32 %v521_v21, %v525_v22  ;;  %s1197_s17 = scalar_lea.vmem %s631_s6, 512 }
  0xb3   : > { %v555_v5 = vld [vmem:[%s1671_s12] sm:$0xff]  ;;  %v543_v7 = vsub.f32 %v535_v2, %v539_v4  ;;  %v531_v12 = vmul.f32 %v527_v3, %v527_v3  ;;  %v556_v15 = vld [vmem:[%s1671_s12 + $0x8] sm:$0xff]  ;;  %v544_v19 = vsub.f32 %v536_v11, %v540_v14  ;;  %v532_v24 = vmul.f32 %v528_v13, %v528_v13  ;;  %v541_v26 = vld [vmem:[%s1684_s16 + $0x10] sm:$0xff]  ;;  %p1198_p6 = scmp.ne.s32.totalorder %s631_s6, %s1197_s17 }
  0xb4   : > { %v559_v6 = vld [vmem:[%s1690_s25] sm:$0xff]  ;;  %v560_v16 = vld [vmem:[%s1690_s25 + $0x8] sm:$0xff]  ;;  %v557_v27 = vld [vmem:[%s1671_s12 + $0x10] sm:$0xff]  ;;  %v545_v31 = vsub.f32 %v537_v23, %v541_v26  ;;  %v533_v36 = vmul.f32 %v529_v25, %v529_v25 }
  0xb5   : > { %v563_v8 = vsub.f32 %v555_v5, %v559_v6  ;;  %v547_v17 = vmul.f32 %v543_v7, %v543_v7  ;;  %v564_v20 = vsub.f32 %v556_v15, %v560_v16  ;;  %v561_v28 = vld [vmem:[%s1690_s25 + $0x10] sm:$0xff]  ;;  %v548_v30 = vmul.f32 %v544_v19, %v544_v19  ;;  %v522_v32 = vld [vmem:[%s1656_s29 + $0x18] sm:$0xff]  ;;  %s880_s29 = sshll.u32 %s1848_s27, 9 }
  0xb6   : > { %v526_v33 = vld [vmem:[%s1678_s26 + $0x18] sm:$0xff]  ;;  %v565_v37 = vsub.f32 %v557_v27, %v561_v28  ;;  %v549_v44 = vmul.f32 %v545_v31, %v545_v31  ;;  %p1851_p11 = scmp.ne.s32.totalorder %s1849_s19, 0 }
  0xb7   : > { %v567_v18 = vmul.f32 %v563_v8, %v563_v8  ;;  %v551_v29 = vadd.f32 %v547_v17, %v531_v12  ;;  %v538_v34 = vld [vmem:[%s1664_s13 + $0x18] sm:$0xff]  ;;  %v568_v35 = vmul.f32 %v564_v20, %v564_v20  ;;  %v530_v38 = vsub.f32 %v522_v32, %v526_v33  ;;  %s628_s15 = scalar_lea.hbm %s1850_s20, %s880_s29  ;;  %s1353_s13 = smov [#allocation13]  }
  0xb8   : > { %v542_v39 = vld [vmem:[%s1684_s16 + $0x18] sm:$0xff]  ;;  %v552_v43 = vadd.f32 %v548_v30, %v532_v24  ;;  %v569_v47 = vmul.f32 %v565_v37, %v565_v37  ;;  %v553_v50 = vadd.f32 %v549_v44, %v533_v36  ;;  %p1199_p8 = pnand %p1198_p6, %p1851_p11  ;;  %s1201_s21 = sshll.u32 %s1353_s13, 4  ;;  %s1202_s21 = int_to_ptr.vmem [resolvable:$false] %s1201_s21 }
  0xb9   : > { %v558_v40 = vld [vmem:[%s1671_s12 + $0x18] sm:$0xff]  ;;  %v571_v42 = vadd.f32 %v567_v18, %v551_v29  ;;  %v546_v45 = vsub.f32 %v538_v34, %v542_v39  ;;  %v534_v48 = vmul.f32 %v530_v38, %v530_v38  ;;  %s1203_s1 = scalar_lea.vmem %s1202_s21, 1024  ;;  %p1204_p4 = scmp.lt.s32.totalorder %s631_s6, %s1202_s21 }
  0xba   : > { %v562_v41 = vld [vmem:[%s1690_s25 + $0x18] sm:$0xff]  ;;  %v572_v49 = vadd.f32 %v568_v35, %v552_v43  ;;  %v573_v53 = vadd.f32 %v569_v47, %v553_v50  ;;  %p1200_p9 = pneg %p1199_p8  ;;  %p1205_p7 = scmp.lt.s32.totalorder %s1203_s1, %s1197_s17 }
  0xbb   : > { %v566_v46 = vsub.f32 %v558_v40, %v562_v41  ;;  %1017 = vrsqrt.f32 %v571_v42  ;;  %v550_v51 = vmul.f32 %v546_v45, %v546_v45  ;;  %vm577_vm0 = vcmp.eq.f32.partialorder %v571_v42, inf }
  0xbc   : > { %1019 = vrsqrt.f32 %v572_v49  ;;  %v580_v57 = vand.u32 2147483648, %v571_v42  ;;  %vm579_vm1 = vcmp.eq.f32.partialorder %v571_v42, 0.0  ;;  %vm584_vm2 = vcmp.eq.f32.partialorder %v572_v49, inf  ;;  %p1206_p3 = por %p1205_p7, %p1204_p4 }
  0xbd   : > { %v570_v52 = vmul.f32 %v566_v46, %v566_v46  ;;  %v554_v54 = vadd.f32 %v550_v51, %v534_v48  ;;  %1021 = vrsqrt.f32 %v573_v53  ;;  %v587_v61 = vand.u32 2147483648, %v572_v49 }
  0xbe   : > { %vm586_vm3 = vcmp.eq.f32.partialorder %v572_v49, 0.0  ;;  %vm591_vm4 = vcmp.eq.f32.partialorder %v573_v53, inf  ;;  %v594_v2 = vand.u32 2147483648, %v573_v53  ;;  %vm593_vm5 = vcmp.eq.f32.partialorder %v573_v53, 0.0  ;;  %p1207_p12 = pnand %p1206_p3, %p1200_p9 }
  0xbf   : > { %v574_v55 = vadd.f32 %v570_v52, %v554_v54 }
  0xc1   : > { %1023 = vrsqrt.f32 %v574_v55  ;;  %vm598_vm6 = vcmp.eq.f32.partialorder %v574_v55, inf  ;;  %v601_v7 = vand.u32 2147483648, %v574_v55  ;;  %vm600_vm7 = vcmp.eq.f32.partialorder %v574_v55, 0.0 }
  0xc8   : > { %v1018_v56 = vpop.eup %1017 }
  0xc9   : > { %v576_v58 = vmul.f32 %v1018_v56, %v571_v42  ;;  %v1020_v59 = vpop.eup %1019 }
  0xca   : > { %v583_v63 = vmul.f32 %v1020_v59, %v572_v49  ;;  %v1022_v0 = vpop.eup %1021 }
  0xcb   : > { %v578_v60 = vsel %vm577_vm0, %v571_v42, %v576_v58  ;;  %v590_v4 = vmul.f32 %v1022_v0, %v573_v53 }
  0xcc   : > { %v581_v62 = vsel %vm579_vm1, %v580_v57, %v578_v60  ;;  %v585_v1 = vsel %vm584_vm2, %v572_v49, %v583_v63 }
  0xcd   : > { %611 = vst [vmem:[%s499_s3] sm:$0xff] %v581_v62  ;;  %v588_v3 = vsel %vm586_vm3, %v587_v61, %v585_v1  ;;  %v592_v6 = vsel %vm591_vm4, %v573_v53, %v590_v4 }
  0xce   : > { %v1024_v5 = vpop.eup %1023  ;;  %612 = vst [vmem:[%s499_s3 + $0x8] sm:$0xff] %v588_v3  ;;  %v595_v8 = vsel %vm593_vm5, %v594_v2, %v592_v6 }
  0xcf   : > { %v597_v9 = vmul.f32 %v1024_v5, %v574_v55  ;;  %613 = vst [vmem:[%s499_s3 + $0x10] sm:$0xff] %v595_v8 }
  0xd1   : > { %v599_v10 = vsel %vm598_vm6, %v574_v55, %v597_v9 }
  0xd2   : > { %v602_v11 = vsel %vm600_vm7, %v601_v7, %v599_v10 }
  0xd3   : > { %614 = vst [vmem:[%s499_s3 + $0x18] sm:$0xff] %v602_v11 }
  0xd4   : > { %1210 = shalt.err (!%p1207_p12)
}
  0xd5   : > { %s1211_s12 = scalar_lea.hbm %s628_s15, 512  ;;  %s1215_s26 = scalar_lea.hbm %s1850_s20, 1024 }
  0xd6   : > { %p1212_p5 = scmp.ne.s32.totalorder %s628_s15, %s1211_s12  ;;  %p1216_p0 = scmp.lt.s32.totalorder %s628_s15, %s1850_s20 }
  0xd7   : > { %p1217_p1 = scmp.lt.s32.totalorder %s1215_s26, %s1211_s12 }
  0xd8   : > { %p1213_p10 = pnand %p1212_p5, %p1851_p11 }
  0xd9   : > { %p1218_p13 = por %p1217_p1, %p1216_p0 }
  0xda   : > { %p1214_p2 = pneg %p1213_p10 }
  0xdc   : > { %p1219_p6 = pnand %p1218_p13, %p1214_p2 }
  0xde   : > { %1222 = shalt.err (!%p1219_p6)
}
  0xdf   : > { %893 = dma.vmem_to_hbm [thread:$0]  (%p1851_p11), %s631_s6, 512, %s628_s15, %s616_s28  }
  0xe0 PF: > { %s1852_s25 = sld [smem:[#allocation23_spill]]  ;;  %p1855_p9 = scmp.ge.s32.totalorder %s1345_s8, 2 }
  0xe1   : > { %s1853_s27 = sld [smem:[#allocation33_spill]] }
  0xe6   : > { %s642_s3 = sand.u32 1, %s1852_s25  }
  0xe7   : > { %p1854_p8 = scmp.ne.s32.totalorder %s1853_s27, 0  ;;  %s643_s29 = scalar_lea.sflag [#allocation4], %s642_s3 }
  0xe9   : > { %p915_p4 = pnand %p1855_p9, %p1854_p8 }
  0xeb   : > { %p916_p7 = pneg %p915_p4 }
  0xed   : > { %1296 = dma.done.wait (%p916_p7), %s643_s29, 512  }
  0xee   : > { %1298 = vsyncadd (%p916_p7), %s643_s29, 4294966784  ;;  %s31_s8 = sadd.s32 1, %s1345_s8   ;;  %s1856_s24 = sld [smem:[#allocation21_spill]] }
  0xef   : > { %p28_p3 = scmp.ge.s32.totalorder %s31_s8, 4   ;;  %s1857_s25 = sld [smem:[#allocation22_spill]] }
  0xf0   : > { %s1858_s26 = sld [smem:[#allocation28_spill]]  ;;  %s1862_s21 = smov %s1305_s22 }
  0xf1   : > { %s1859_s27 = sld [smem:[#allocation24_spill]]  ;;  %s1863_s22 = smov %s1309_s23 }
  0xf2   : > { %s1860_s28 = sld [smem:[#allocation25_spill]]  ;;  %s1864_s23 = smov %s1587_s11 }
  0xf3   : > { %s1861_s29 = sld [smem:[#allocation30_spill]]  ;;  %s1865_s30 = smov %s1341_s7 }
  0xf4   : > { %s1866_s7 = smov %s1868_s10  ;;  %30 = sbr.rel (!%p28_p3) target bundleno = 19 (0x13), region = 154 }
  0xf9   :  { %648 = vsyncpa [#allocation3], 1 }
  0xfa   :  { %650 = vsyncpa [#allocation3 + $0x1], 1 }
  0xfb   :  { %651 = vsyncpa [#allocation6], 1 }
  0xfc   :  { %653 = vsyncpa [#allocation6 + $0x1], 1 }
  0xfd   :  { %654 = vsyncpa [#allocation9], 1 }
  0xfe   :  { %656 = vsyncpa [#allocation9 + $0x1], 1 }
  0xff   :  { %657 = vsyncpa [#allocation12], 1 }
 0x100   :  { %659 = vsyncpa [#allocation12 + $0x1], 1 }
 0x101   :  { %660 = vsyncpa [#allocation4], 1 }
 0x102   :  { %662 = vsyncpa [#allocation4 + $0x1], 1 }

</bundles_post_ra>
